<compile_context>
chip_gen: v7x
topology: tpu7x:2x2x1
jax: 0.10.0
libtpu: 0.0.40
codegen_flags: <defaults>
</compile_context>

<pallas_src>
import math
import functools

import jax
import jax.numpy as jnp
from jax.experimental import pallas as pl
from jax.experimental.pallas import tpu as pltpu


# ---------------------------------------------------------------------------
# Kernel 1: fused Q/K/V projections (bf16 operands, f32 accumulation).
# ---------------------------------------------------------------------------
def _qkv_proj_kernel(q_ref, k_ref, v_ref,
                     wq_ref, bq_ref, wk_ref, bk_ref, wv_ref, bv_ref,
                     qo_ref, ko_ref, vo_ref, *, scale):
    def proj(x_ref, w_ref, b_ref):
        return (jnp.dot(x_ref[0], w_ref[...],
                        preferred_element_type=jnp.float32) + b_ref[0])

    # Fold 1/sqrt(per_head_size) into Q once instead of scaling every
    # (tq, tk) score tile per head.
    q = proj(q_ref, wq_ref, bq_ref) * scale
    k = proj(k_ref, wk_ref, bk_ref)
    v = proj(v_ref, wv_ref, bv_ref)

    qo_ref[0] = q.astype(qo_ref.dtype)
    ko_ref[0] = k.astype(ko_ref.dtype)
    vo_ref[0] = v.astype(vo_ref.dtype)


# ---------------------------------------------------------------------------
# Kernel 2: flash-style attention (online softmax) + fused output projection.
# ---------------------------------------------------------------------------
def _flash_attn_kernel(q_ref, k_ref, v_ref, mask_ref, wo_ref, bo_ref,
                       out_ref, m_sc, l_sc, acc_sc):
    ki = pl.program_id(2)

    @pl.when(ki == 0)
    def _():
        m_sc[...] = jnp.full(m_sc.shape, -jnp.inf, dtype=m_sc.dtype)
        l_sc[...] = jnp.zeros(l_sc.shape, dtype=l_sc.dtype)
        acc_sc[...] = jnp.zeros(acc_sc.shape, dtype=acc_sc.dtype)

    q = q_ref[0]        # (heads, tq, d)  bf16, pre-scaled by 1/sqrt(d)
    k = k_ref[0]        # (heads, tk, d)  bf16
    v = v_ref[0]        # (heads, tk, d)  bf16
    mask = mask_ref[0, 0].astype(jnp.float32)   # (tq, tk) additive mask

    # Head-batched scores: contraction over d, batched over heads (no
    # lane-offset per-head slicing, no per-head tiny matmuls in a Python loop).
    s = jnp.einsum('hqd,hkd->hqk', q, k,
                   preferred_element_type=jnp.float32)      # (heads, tq, tk)
    s = s + mask[None, :, :]

    m_prev = m_sc[...]                                       # (heads, tq, 1)
    m_new = jnp.maximum(m_prev, jnp.max(s, axis=-1, keepdims=True))
    alpha = jnp.exp(m_prev - m_new)
    p = jnp.exp(s - m_new)                                   # (heads, tq, tk)

    l_sc[...] = alpha * l_sc[...] + jnp.sum(p, axis=-1, keepdims=True)
    acc_sc[...] = alpha * acc_sc[...] + jnp.einsum(
        'hqk,hkd->hqd', p.astype(v.dtype), v,
        preferred_element_type=jnp.float32)
    m_sc[...] = m_new

    # TODO(synk): dropout on attention probabilities is omitted (eval mode).

    @pl.when(ki == pl.num_programs(2) - 1)
    def _():
        # Normalize (approx reciprocal runs on the EUP slot), then fuse the
        # output projection: Wo reshaped to (heads, d, H) makes
        # "transpose + concat + matmul" a single batched matmul + head-sum,
        # with no in-kernel relayout or concatenation.
        ctx = acc_sc[...] * pl.reciprocal(l_sc[...], approx=True)
        part = jnp.einsum('hqd,hdo->hqo', ctx.astype(wo_ref.dtype),
                          wo_ref[...], preferred_element_type=jnp.float32)
        out = jnp.sum(part, axis=0) + bo_ref[0]
        out_ref[0] = out.astype(out_ref.dtype)


# ---------------------------------------------------------------------------
# Host-side wrapper.
# ---------------------------------------------------------------------------
def _pick_seq_tile(s, target):
    """Largest tile <= target that divides s (multiples of 16), else full s."""
    if s <= target:
        return s
    t = target
    while t >= 16:
        if s % t == 0:
            return t
        t //= 2
    # TODO(synk): pad ragged sequence lengths instead of a full-S fallback.
    return s


def _vmem_limit_bytes(block_bytes, scratch_bytes=0):
    # Double-buffered blocks + scratch + slack; clamp for v7x's 64 MiB VMEM.
    need = 2 * int(block_bytes) + int(scratch_bytes) + (2 << 20)
    return int(min(max(need, 16 << 20), 64 << 20))


def multi_headed_attention(key, value, query, mask, params, heads_num,
                           compute_dtype=jnp.bfloat16):
    B, S, H = key.shape
    d = H // heads_num
    assert heads_num * d == H
    scale = 1.0 / math.sqrt(float(d))
    out_dtype = query.dtype
    itemsize_out = jnp.dtype(out_dtype).itemsize

    # Weights pre-transposed to [in, out]; matmul operands in bf16 (MXU-native
    # on v5e/v6e/v7x, halves HBM/VMEM residency). Biases stay f32 and are added
    # to the f32 accumulators. Wo is reshaped to (heads, d, H) so the output
    # projection fuses directly with the head-major context.
    wq = params["wq"].T.astype(compute_dtype)
    wk = params["wk"].T.astype(compute_dtype)
    wv = params["wv"].T.astype(compute_dtype)
    wo = params["wo"].T.reshape(heads_num, d, H).astype(compute_dtype)
    bq = params["bq"].reshape(1, H).astype(jnp.float32)
    bk = params["bk"].reshape(1, H).astype(jnp.float32)
    bv = params["bv"].reshape(1, H).astype(jnp.float32)
    bo = params["bo"].reshape(1, H).astype(jnp.float32)

    q_in = query.astype(compute_dtype)
    k_in = key.astype(compute_dtype)
    v_in = value.astype(compute_dtype)
    # Additive mask in bf16: halves the largest DMA stream (B*S^2 elements);
    # 0 / -1e4 values are unaffected for softmax purposes.
    mask_c = mask.astype(compute_dtype)

    # ---------------- Kernel 1: Q/K/V projections ----------------
    ts = _pick_seq_tile(S, 256)
    n_s = S // ts

    x_spec = pl.BlockSpec((1, ts, H), lambda b, si: (b, si, 0))
    w_spec = pl.BlockSpec((H, H), lambda b, si: (0, 0))
    b_spec = pl.BlockSpec((1, H), lambda b, si: (0, 0))

    proj_block_bytes = (3 * ts * H * 2          # q/k/v input tiles (bf16)
                        + 3 * H * H * 2         # weights (bf16)
                        + 3 * H * 4             # biases (f32)
                        + 3 * ts * H * 2)       # output tiles (bf16)
    # NOTE: weight/bias index_maps are grid-constant, so Pallas re-uses the
    # resident block between steps (no per-step re-DMA).

    q_p, k_p, v_p = pl.pallas_call(
        functools.partial(_qkv_proj_kernel, scale=scale),
        out_shape=(jax.ShapeDtypeStruct((B, S, H), compute_dtype),
                   jax.ShapeDtypeStruct((B, S, H), compute_dtype),
                   jax.ShapeDtypeStruct((B, S, H), compute_dtype)),
        grid_spec=pltpu.PrefetchScalarGridSpec(
            num_scalar_prefetch=0,
            grid=(B, n_s),
            in_specs=[x_spec, x_spec, x_spec,
                      w_spec, b_spec, w_spec, b_spec, w_spec, b_spec],
            out_specs=[x_spec, x_spec, x_spec],
        ),
        compiler_params=pltpu.CompilerParams(
            dimension_semantics=("parallel", "parallel"),
            vmem_limit_bytes=_vmem_limit_bytes(proj_block_bytes),
        ),
    )(q_in, k_in, v_in, wq, bq, wk, bk, wv, bv)

    # Layout plumbing only (XLA): head-major [B, heads, S, d] so the attention
    # kernel works on lane-contiguous per-head slabs.
    def to_heads(x):
        return x.reshape(B, S, heads_num, d).transpose(0, 2, 1, 3)

    q_h, k_h, v_h = to_heads(q_p), to_heads(k_p), to_heads(v_p)

    # ---------------- Kernel 2: flash attention + out projection ----------------
    tq = _pick_seq_tile(S, 128)
    tk = _pick_seq_tile(S, 128)
    n_q, n_k = S // tq, S // tk

    q_spec = pl.BlockSpec((1, heads_num, tq, d), lambda b, qi, ki: (b, 0, qi, 0))
    kv_spec = pl.BlockSpec((1, heads_num, tk, d), lambda b, qi, ki: (b, 0, ki, 0))
    mask_spec = pl.BlockSpec((1, 1, tq, tk), lambda b, qi, ki: (b, 0, qi, ki))
    wo_spec = pl.BlockSpec((heads_num, d, H), lambda b, qi, ki: (0, 0, 0))
    bo_spec = pl.BlockSpec((1, H), lambda b, qi, ki: (0, 0))
    out_spec = pl.BlockSpec((1, tq, H), lambda b, qi, ki: (b, qi, 0))

    attn_block_bytes = (heads_num * tq * d * 2          # q tile
                        + 2 * heads_num * tk * d * 2    # k, v tiles
                        + tq * tk * 2                   # mask tile
                        + H * H * 2 + H * 4             # wo, bo
                        + tq * H * itemsize_out)        # output tile
    attn_scratch_bytes = heads_num * tq * (2 + d) * 4   # m, l, acc (f32)

    out = pl.pallas_call(
        _flash_attn_kernel,
        out_shape=jax.ShapeDtypeStruct((B, S, H), out_dtype),
        grid_spec=pltpu.PrefetchScalarGridSpec(
            num_scalar_prefetch=0,
            grid=(B, n_q, n_k),
            in_specs=[q_spec, kv_spec, kv_spec, mask_spec, wo_spec, bo_spec],
            out_specs=out_spec,
            scratch_shapes=[
                pltpu.VMEM((heads_num, tq, 1), jnp.float32),   # m (running max)
                pltpu.VMEM((heads_num, tq, 1), jnp.float32),   # l (running sum)
                pltpu.VMEM((heads_num, tq, d), jnp.float32),   # acc
            ],
        ),
        compiler_params=pltpu.CompilerParams(
            dimension_semantics=("parallel", "parallel", "arbitrary"),
            vmem_limit_bytes=_vmem_limit_bytes(attn_block_bytes,
                                               attn_scratch_bytes),
        ),
    )(q_h, k_h, v_h, mask_c, wo, bo)

    return out


# ---------------------------------------------------------------------------
# Pure-JAX reference (matches the PyTorch forward in eval mode, f32).
# ---------------------------------------------------------------------------
def reference_mha(key, value, query, mask, params, heads_num):
    B, S, H = key.shape
    d = H // heads_num

    def lin(x, w, b):
        return x @ w.T + b

    def shape(x):
        return x.reshape(B, S, heads_num, d).transpose(0, 2, 1, 3)

    q = shape(lin(query, params["wq"], params["bq"]))
    k = shape(lin(key, params["wk"], params["bk"]))
    v = shape(lin(value, params["wv"], params["bv"]))

    scores = jnp.einsum("bhqd,bhkd->bhqk", q, k) / math.sqrt(float(d))
    scores = scores + mask
    probs = jax.nn.softmax(scores, axis=-1)
    out = jnp.einsum("bhqk,bhkd->bhqd", probs, v)
    out = out.transpose(0, 2, 1, 3).reshape(B, S, H)
    return lin(out, params["wo"], params["bo"])


if __name__ == "__main__":
    # Small deterministic example: batch=2, seq=8, hidden=32, heads=4.
    B, S, H, NH = 2, 8, 32, 4

    root = jax.random.PRNGKey(0)
    keys = jax.random.split(root, 12)

    params = {
        "wq": jax.random.normal(keys[0], (H, H), jnp.float32) * 0.1,
        "bq": jax.random.normal(keys[1], (H,), jnp.float32) * 0.1,
        "wk": jax.random.normal(keys[2], (H, H), jnp.float32) * 0.1,
        "bk": jax.random.normal(keys[3], (H,), jnp.float32) * 0.1,
        "wv": jax.random.normal(keys[4], (H, H), jnp.float32) * 0.1,
        "bv": jax.random.normal(keys[5], (H,), jnp.float32) * 0.1,
        "wo": jax.random.normal(keys[6], (H, H), jnp.float32) * 0.1,
        "bo": jax.random.normal(keys[7], (H,), jnp.float32) * 0.1,
    }

    key_in = jax.random.normal(keys[8], (B, S, H), jnp.float32)
    value_in = jax.random.normal(keys[9], (B, S, H), jnp.float32)
    query_in = jax.random.normal(keys[10], (B, S, H), jnp.float32)
    # Additive mask: 0 where attended, -10000 where masked (causal example).
    causal = jnp.tril(jnp.ones((S, S), jnp.float32))
    mask_in = ((1.0 - causal) * -10000.0)[None, None, :, :].repeat(B, axis=0)

    out = multi_headed_attention(key_in, value_in, query_in, mask_in, params, NH)
    out = jax.block_until_ready(out)

    ref = reference_mha(key_in, value_in, query_in, mask_in, params, NH)
    assert out.shape == (B, S, H)
    max_err = float(jnp.max(jnp.abs(out - ref)))
    # bf16 matmul operands + approx reciprocal => loosen tolerance vs f32 ref.
    assert jnp.allclose(out, ref, atol=3e-2, rtol=3e-2), max_err

    print("KERNEL_OK")
</pallas_src>

<mosaic_0001>
module attributes {stable_mosaic.version = 11 : i64} {
  func.func @_qkv_proj_kernel(%arg0: i32, %arg1: i32, %arg2: memref<1x8x32xbf16, #tpu.memory_space<vmem>>, %arg3: memref<1x8x32xbf16, #tpu.memory_space<vmem>>, %arg4: memref<1x8x32xbf16, #tpu.memory_space<vmem>>, %arg5: memref<32x32xbf16, #tpu.memory_space<vmem>>, %arg6: memref<1x32xf32, #tpu.memory_space<vmem>>, %arg7: memref<32x32xbf16, #tpu.memory_space<vmem>>, %arg8: memref<1x32xf32, #tpu.memory_space<vmem>>, %arg9: memref<32x32xbf16, #tpu.memory_space<vmem>>, %arg10: memref<1x32xf32, #tpu.memory_space<vmem>>, %arg11: memref<1x8x32xbf16, #tpu.memory_space<vmem>>, %arg12: memref<1x8x32xbf16, #tpu.memory_space<vmem>>, %arg13: memref<1x8x32xbf16, #tpu.memory_space<vmem>>) attributes {dimension_semantics = [#tpu.dimension_semantics<parallel>, #tpu.dimension_semantics<parallel>], iteration_bounds = array<i64: 2, 1>, scalar_prefetch = 0 : i64, scratch_operands = 0 : i64, tpu.core_type = #tpu.core_type<tc>, window_params = [{transform_indices = @transform_0, window_bounds = array<i64: 1, 8, 32>}, {transform_indices = @transform_1, window_bounds = array<i64: 1, 8, 32>}, {transform_indices = @transform_2, window_bounds = array<i64: 1, 8, 32>}, {pipeline_mode = #tpu.pipeline_mode<synchronous>, transform_indices = @transform_3, window_bounds = array<i64: 32, 32>}, {pipeline_mode = #tpu.pipeline_mode<synchronous>, transform_indices = @transform_4, window_bounds = array<i64: 1, 32>}, {pipeline_mode = #tpu.pipeline_mode<synchronous>, transform_indices = @transform_5, window_bounds = array<i64: 32, 32>}, {pipeline_mode = #tpu.pipeline_mode<synchronous>, transform_indices = @transform_6, window_bounds = array<i64: 1, 32>}, {pipeline_mode = #tpu.pipeline_mode<synchronous>, transform_indices = @transform_7, window_bounds = array<i64: 32, 32>}, {pipeline_mode = #tpu.pipeline_mode<synchronous>, transform_indices = @transform_8, window_bounds = array<i64: 1, 32>}, {transform_indices = @transform_9, window_bounds = array<i64: 1, 8, 32>}, {transform_indices = @transform_10, window_bounds = array<i64: 1, 8, 32>}, {transform_indices = @transform_11, window_bounds = array<i64: 1, 8, 32>}]} {
    %c0 = arith.constant 0 : index
    %c0_0 = arith.constant 0 : index
    %c0_1 = arith.constant 0 : index
    %0 = vector.load %arg2[%c0, %c0_0, %c0_1] : memref<1x8x32xbf16, #tpu.memory_space<vmem>>, vector<1x8x32xbf16>
    %1 = vector.shape_cast %0 : vector<1x8x32xbf16> to vector<8x32xbf16>
    %c0_2 = arith.constant 0 : index
    %c0_3 = arith.constant 0 : index
    %2 = vector.load %arg5[%c0_2, %c0_3] : memref<32x32xbf16, #tpu.memory_space<vmem>>, vector<32x32xbf16>
    %cst = arith.constant dense<0.000000e+00> : vector<8x32xf32>
    %3 = tpu.matmul %1, %2, %cst {dimension_numbers = #tpu.dot_dimension_numbers<[1], [0], [0], [1], [0, 0, 1, 1], [], []>} : vector<8x32xbf16>, vector<32x32xbf16>, vector<8x32xf32> -> vector<8x32xf32>
    %c0_4 = arith.constant 0 : index
    %c0_5 = arith.constant 0 : index
    %4 = vector.load %arg6[%c0_4, %c0_5] : memref<1x32xf32, #tpu.memory_space<vmem>>, vector<1x32xf32>
    %5 = vector.shape_cast %4 : vector<1x32xf32> to vector<32xf32>
    %6 = vector.shape_cast %5 : vector<32xf32> to vector<1x32xf32>
    %7 = vector.broadcast %6 : vector<1x32xf32> to vector<8x32xf32>
    %8 = arith.addf %3, %7 : vector<8x32xf32>
    %cst_6 = arith.constant 0.353553385 : f32
    %9 = vector.broadcast %cst_6 : f32 to vector<8x32xf32>
    %10 = arith.mulf %8, %9 : vector<8x32xf32>
    %c0_7 = arith.constant 0 : index
    %c0_8 = arith.constant 0 : index
    %c0_9 = arith.constant 0 : index
    %11 = vector.load %arg3[%c0_7, %c0_8, %c0_9] : memref<1x8x32xbf16, #tpu.memory_space<vmem>>, vector<1x8x32xbf16>
    %12 = vector.shape_cast %11 : vector<1x8x32xbf16> to vector<8x32xbf16>
    %c0_10 = arith.constant 0 : index
    %c0_11 = arith.constant 0 : index
    %13 = vector.load %arg7[%c0_10, %c0_11] : memref<32x32xbf16, #tpu.memory_space<vmem>>, vector<32x32xbf16>
    %cst_12 = arith.constant dense<0.000000e+00> : vector<8x32xf32>
    %14 = tpu.matmul %12, %13, %cst_12 {dimension_numbers = #tpu.dot_dimension_numbers<[1], [0], [0], [1], [0, 0, 1, 1], [], []>} : vector<8x32xbf16>, vector<32x32xbf16>, vector<8x32xf32> -> vector<8x32xf32>
    %c0_13 = arith.constant 0 : index
    %c0_14 = arith.constant 0 : index
    %15 = vector.load %arg8[%c0_13, %c0_14] : memref<1x32xf32, #tpu.memory_space<vmem>>, vector<1x32xf32>
    %16 = vector.shape_cast %15 : vector<1x32xf32> to vector<32xf32>
    %17 = vector.shape_cast %16 : vector<32xf32> to vector<1x32xf32>
    %18 = vector.broadcast %17 : vector<1x32xf32> to vector<8x32xf32>
    %19 = arith.addf %14, %18 : vector<8x32xf32>
    %c0_15 = arith.constant 0 : index
    %c0_16 = arith.constant 0 : index
    %c0_17 = arith.constant 0 : index
    %20 = vector.load %arg4[%c0_15, %c0_16, %c0_17] : memref<1x8x32xbf16, #tpu.memory_space<vmem>>, vector<1x8x32xbf16>
    %21 = vector.shape_cast %20 : vector<1x8x32xbf16> to vector<8x32xbf16>
    %c0_18 = arith.constant 0 : index
    %c0_19 = arith.constant 0 : index
    %22 = vector.load %arg9[%c0_18, %c0_19] : memref<32x32xbf16, #tpu.memory_space<vmem>>, vector<32x32xbf16>
    %cst_20 = arith.constant dense<0.000000e+00> : vector<8x32xf32>
    %23 = tpu.matmul %21, %22, %cst_20 {dimension_numbers = #tpu.dot_dimension_numbers<[1], [0], [0], [1], [0, 0, 1, 1], [], []>} : vector<8x32xbf16>, vector<32x32xbf16>, vector<8x32xf32> -> vector<8x32xf32>
    %c0_21 = arith.constant 0 : index
    %c0_22 = arith.constant 0 : index
    %24 = vector.load %arg10[%c0_21, %c0_22] : memref<1x32xf32, #tpu.memory_space<vmem>>, vector<1x32xf32>
    %25 = vector.shape_cast %24 : vector<1x32xf32> to vector<32xf32>
    %26 = vector.shape_cast %25 : vector<32xf32> to vector<1x32xf32>
    %27 = vector.broadcast %26 : vector<1x32xf32> to vector<8x32xf32>
    %28 = arith.addf %23, %27 : vector<8x32xf32>
    %29 = arith.truncf %10 : vector<8x32xf32> to vector<8x32xbf16>
    %c0_23 = arith.constant 0 : index
    %c0_24 = arith.constant 0 : index
    %c0_25 = arith.constant 0 : index
    %30 = vector.load %arg11[%c0_23, %c0_24, %c0_25] : memref<1x8x32xbf16, #tpu.memory_space<vmem>>, vector<1x8x32xbf16>
    %31 = vector.shape_cast %30 : vector<1x8x32xbf16> to vector<8x32xbf16>
    %32 = vector.shape_cast %29 : vector<8x32xbf16> to vector<1x8x32xbf16>
    tpu.vector_store %arg11[%c0_23, %c0_24, %c0_25], %32 {strides = array<i32>} : memref<1x8x32xbf16, #tpu.memory_space<vmem>>, vector<1x8x32xbf16>,
    %33 = arith.truncf %19 : vector<8x32xf32> to vector<8x32xbf16>
    %c0_26 = arith.constant 0 : index
    %c0_27 = arith.constant 0 : index
    %c0_28 = arith.constant 0 : index
    %34 = vector.load %arg12[%c0_26, %c0_27, %c0_28] : memref<1x8x32xbf16, #tpu.memory_space<vmem>>, vector<1x8x32xbf16>
    %35 = vector.shape_cast %34 : vector<1x8x32xbf16> to vector<8x32xbf16>
    %36 = vector.shape_cast %33 : vector<8x32xbf16> to vector<1x8x32xbf16>
    tpu.vector_store %arg12[%c0_26, %c0_27, %c0_28], %36 {strides = array<i32>} : memref<1x8x32xbf16, #tpu.memory_space<vmem>>, vector<1x8x32xbf16>,
    %37 = arith.truncf %28 : vector<8x32xf32> to vector<8x32xbf16>
    %c0_29 = arith.constant 0 : index
    %c0_30 = arith.constant 0 : index
    %c0_31 = arith.constant 0 : index
    %38 = vector.load %arg13[%c0_29, %c0_30, %c0_31] : memref<1x8x32xbf16, #tpu.memory_space<vmem>>, vector<1x8x32xbf16>
    %39 = vector.shape_cast %38 : vector<1x8x32xbf16> to vector<8x32xbf16>
    %40 = vector.shape_cast %37 : vector<8x32xbf16> to vector<1x8x32xbf16>
    tpu.vector_store %arg13[%c0_29, %c0_30, %c0_31], %40 {strides = array<i32>} : memref<1x8x32xbf16, #tpu.memory_space<vmem>>, vector<1x8x32xbf16>,
    return
  }
  func.func @transform_0(%arg0: i32, %arg1: i32) -> (i32, i32, i32) {
    %c0_i32 = arith.constant 0 : i32
    %c0_i32_0 = arith.constant 0 : i32
    return %arg0, %arg1, %c0_i32 : i32, i32, i32
  }
  func.func @transform_1(%arg0: i32, %arg1: i32) -> (i32, i32, i32) {
    %c0_i32 = arith.constant 0 : i32
    %c0_i32_0 = arith.constant 0 : i32
    return %arg0, %arg1, %c0_i32 : i32, i32, i32
  }
  func.func @transform_2(%arg0: i32, %arg1: i32) -> (i32, i32, i32) {
    %c0_i32 = arith.constant 0 : i32
    %c0_i32_0 = arith.constant 0 : i32
    return %arg0, %arg1, %c0_i32 : i32, i32, i32
  }
  func.func @transform_3(%arg0: i32, %arg1: i32) -> (i32, i32) {
    %c0_i32 = arith.constant 0 : i32
    %c0_i32_0 = arith.constant 0 : i32
    %c0_i32_1 = arith.constant 0 : i32
    return %c0_i32, %c0_i32_0 : i32, i32
  }
  func.func @transform_4(%arg0: i32, %arg1: i32) -> (i32, i32) {
    %c0_i32 = arith.constant 0 : i32
    %c0_i32_0 = arith.constant 0 : i32
    %c0_i32_1 = arith.constant 0 : i32
    return %c0_i32, %c0_i32_0 : i32, i32
  }
  func.func @transform_5(%arg0: i32, %arg1: i32) -> (i32, i32) {
    %c0_i32 = arith.constant 0 : i32
    %c0_i32_0 = arith.constant 0 : i32
    %c0_i32_1 = arith.constant 0 : i32
    return %c0_i32, %c0_i32_0 : i32, i32
  }
  func.func @transform_6(%arg0: i32, %arg1: i32) -> (i32, i32) {
    %c0_i32 = arith.constant 0 : i32
    %c0_i32_0 = arith.constant 0 : i32
    %c0_i32_1 = arith.constant 0 : i32
    return %c0_i32, %c0_i32_0 : i32, i32
  }
  func.func @transform_7(%arg0: i32, %arg1: i32) -> (i32, i32) {
    %c0_i32 = arith.constant 0 : i32
    %c0_i32_0 = arith.constant 0 : i32
    %c0_i32_1 = arith.constant 0 : i32
    return %c0_i32, %c0_i32_0 : i32, i32
  }
  func.func @transform_8(%arg0: i32, %arg1: i32) -> (i32, i32) {
    %c0_i32 = arith.constant 0 : i32
    %c0_i32_0 = arith.constant 0 : i32
    %c0_i32_1 = arith.constant 0 : i32
    return %c0_i32, %c0_i32_0 : i32, i32
  }
  func.func @transform_9(%arg0: i32, %arg1: i32) -> (i32, i32, i32) {
    %c0_i32 = arith.constant 0 : i32
    %c0_i32_0 = arith.constant 0 : i32
    return %arg0, %arg1, %c0_i32 : i32, i32, i32
  }
  func.func @transform_10(%arg0: i32, %arg1: i32) -> (i32, i32, i32) {
    %c0_i32 = arith.constant 0 : i32
    %c0_i32_0 = arith.constant 0 : i32
    return %arg0, %arg1, %c0_i32 : i32, i32, i32
  }
  func.func @transform_11(%arg0: i32, %arg1: i32) -> (i32, i32, i32) {
    %c0_i32 = arith.constant 0 : i32
    %c0_i32_0 = arith.constant 0 : i32
    return %arg0, %arg1, %c0_i32 : i32, i32, i32
  }
}

</mosaic_0001>

<bundles_post_ra>
// kernel: tpu_custom_call.1
= control target key start
LH: loop header
LB: loop body
LE: loop exit
PB: predicated region body
PF: predicated region fallthrough
CT: control target
= control target key end

     0   :  { %s1995_s0 = inlined_call_operand.hbm [shape: bf16[2,8,32], index: 0, kind: input, shape index: {}]   ;;  %s1996_s1 = inlined_call_operand.hbm [shape: bf16[2,8,32], index: 1, kind: input, shape index: {}]   ;;  %s1997_s2 = inlined_call_operand.hbm [shape: bf16[2,8,32], index: 2, kind: input, shape index: {}]   ;;  %s1998_s3 = inlined_call_operand.hbm [shape: bf16[32,32], index: 3, kind: input, shape index: {}]   ;;  %s1999_s4 = inlined_call_operand.vmem [shape: f32[1,32], index: 4, kind: input, shape index: {}]   ;;  %s2000_s5 = inlined_call_operand.vmem [shape: bf16[32,32], index: 5, kind: input, shape index: {}]   ;;  %s2001_s6 = inlined_call_operand.vmem [shape: f32[1,32], index: 6, kind: input, shape index: {}]   ;;  %s2002_s7 = inlined_call_operand.hbm [shape: bf16[32,32], index: 7, kind: input, shape index: {}]   ;;  %s2003_s8 = inlined_call_operand.vmem [shape: f32[1,32], index: 8, kind: input, shape index: {}]   ;;  %s2004_s9 = inlined_call_operand.hbm [shape: bf16[2,8,32], index: 9, kind: output, shape index: {0}]   ;;  %s2005_s10 = inlined_call_operand.hbm [shape: bf16[2,8,32], index: 10, kind: output, shape index: {1}]   ;;  %s2006_s11 = inlined_call_operand.hbm [shape: bf16[2,8,32], index: 11, kind: output, shape index: {2}]  }
   0x1   :  { %2030 = sst [smem:[#allocation26_spill]] %s1996_s1 }
   0x2   :  { %2031 = sst [smem:[#allocation27_spill]] %s1998_s3 }
   0x3   :  { %2032 = sst [smem:[#allocation28_spill]] %s2002_s7 }
   0x4   :  { %2033 = sst [smem:[#allocation29_spill]] %s2003_s8 }
   0x5   :  { %2034 = sst [smem:[#allocation30_spill]] %s2004_s9 }
   0x6   :  { %2035 = sst [smem:[#allocation31_spill]] %s2006_s11 }
   0x7   :  { %17 = vsyncpa [#allocation3], 0 }
   0x8   :  { %19 = vsyncpa [#allocation3 + $0x1], 0 }
   0x9   :  { %20 = vsyncpa [#allocation6], 0 }
   0xa   :  { %22 = vsyncpa [#allocation6 + $0x1], 0 }
   0xb   :  { %23 = vsyncpa [#allocation9], 0 }
   0xc   :  { %24 = vsyncpa [#allocation4], 0 }
   0xd   :  { %26 = vsyncpa [#allocation4 + $0x1], 0 }
   0xe   :  { %27 = vsyncpa [#allocation13], 0 }
   0xf   :  { %29 = vsyncpa [#allocation13 + $0x1], 0  ;;  %s1575_s17 = smov 0   ;;  %s1577_s18 = smov 0  }
  0x10   :  { %s1579_s19 = smov 0   ;;  %s1581_s20 = smov 0  }
  0x11   :  { %s1583_s21 = smov 0   ;;  %s1585_s22 = smov 0  }
  0x12 LB: > { %2036 = sst [smem:[#allocation20_spill]] %s1481_s17  ;;  %s1606_s23 = sadd.s32 4294967295, %s1501_s22   ;;  %s1501_s22 = sphi %s1585_s22, %s35_s22   ;;  %s1497_s21 = sphi %s1583_s21, %s2079_s21   ;;  %s1493_s20 = sphi %s1581_s20, %s2078_s20   ;;  %s1489_s19 = sphi %s1579_s19, %s2082_s19   ;;  %s1485_s18 = sphi %s1577_s18, %s2081_s18   ;;  %s1481_s17 = sphi %s1575_s17, %s2080_s17  }
  0x13   : > { %2037 = sst [smem:[#allocation21_spill]] %s1497_s21  ;;  %s2007_s24 = sadd.s32 4294967294, %s1501_s22  }
  0x14   : > { %2038 = sst [smem:[#allocation22_spill]] %s1501_s22  ;;  %p69_p0 = scmp.ne.s32.totalorder %s1485_s18, %s1481_s17 }
  0x15   : > { %p2010_p1 = scmp.eq.s32.totalorder %s1606_s23, 0  ;;  %p283_p3 = scmp.eq.s32.totalorder %s2007_s24, 1 }
  0x16   : > { %p1020_p5 = scmp.ge.s32.totalorder %s1501_s22, 1  ;;  %p346_p7 = scmp.lt.s32.totalorder %s1501_s22, 3 }
  0x17   : > { %p1617_p4 = por %p2010_p1, %p69_p0  ;;  %p1622_p6 = por %p283_p3, %p69_p0 }
  0x18   : > { %p1627_p8 = pnand %p1020_p5, %p346_p7  ;;  %s1503_s28 = smov [#allocation8]  }
  0x19   : > { %s2039_s25 = scalar_select %p1617_p4, 1, 0 }
  0x1a   : > { %s2040_s26 = scalar_select %p1622_p6, 1, 0 }
  0x1b   : > { %s2042_s27 = scalar_select %p1627_p8, 1, 0 }
  0x1c   : > { %2041 = sst [smem:[#allocation23_spill]] %s2040_s26  ;;  %s358_s29 = sshll.u32 %s1503_s28, 4  ;;  %s359_s29 = int_to_ptr.vmem [resolvable:$true] %s358_s29 }
  0x1d   : > { %p1112_p9 = pneg %p1627_p8  ;;  %s47_s12 = sadd.s32 1, %s1497_s21 }
  0x1e   : > { %s2044_s3 = sld [smem:[#allocation27_spill]] }
  0x1f   : > { %p1636_p11 = pnand %p1112_p9, %p2010_p1 }
  0x21   : > { %s2043_s30 = scalar_select %p1636_p11, 1, 0 }
  0x22   : > { %p2022_p13 = pneg %p1636_p11 }
  0x24   : > { %s1205_s15 = scalar_lea.hbm %s2044_s3, 256 }
  0x25   : > { %p1206_p12 = scmp.ne.s32.totalorder %s2044_s3, %s1205_s15  ;;  %p1212_p5 = scmp.lt.u32.totalorder %s1205_s15, %s2044_s3 }
  0x27   : > { %p1208_p0 = pnand %p2022_p13, %p1206_p12 }
  0x29   : > { %p1209_p3 = pneg %p1208_p0 }
  0x2b   : > { %p1214_p7 = pnand %p1212_p5, %p1209_p3 }
  0x2d   : > { %1217 = shalt.err (!%p1214_p7)
}
  0x2e   : > { %s1218_s17 = scalar_lea.vmem %s359_s29, 256  ;;  %p1226_p2 = scmp.lt.s32.totalorder %s359_s29, %s359_s29 }
  0x2f   : > { %p1219_p9 = scmp.ne.s32.totalorder %s359_s29, %s1218_s17  ;;  %p1227_p6 = scmp.lt.s32.totalorder %s1218_s17, %s1218_s17 }
  0x31   : > { %p1221_p10 = pnand %p1219_p9, %p2022_p13  ;;  %p1228_p4 = por %p1227_p6, %p1226_p2 }
  0x33   : > { %p1222_p1 = pneg %p1221_p10 }
  0x35   : > { %p1229_p8 = pnand %p1228_p4, %p1222_p1 }
  0x37   : > { %1232 = shalt.err (!%p1229_p8)
}
  0x38   : > { %s2013_s24 = smov 64   ;;  %s2014_s26 = smov 4  }
  0x39   : > { %1115 = dma.hbm_to_vmem [thread:$0]  (!%p1636_p11), %s2044_s3, 256, %s359_s29, [#allocation9], %s2013_s24, %s2013_s24, %s2014_s26  }
  0x3a   : > { %p49_p1 = scmp.ge.s32.totalorder %s47_s12, 2  ;;  %s56_s14 = sadd.s32 1, %s1489_s19 }
  0x3b   : > { %p63_p2 = scmp.ne.s32.totalorder %s1489_s19, %s1485_s18  ;;  %p64_p4 = scmp.eq.s32.totalorder %s1501_s22, 0 }
  0x3c   : > { %s2084_s12 = smov (%p49_p1, %s47_s12), 0  ;;  %p2046_p8 = scmp.eq.s32.totalorder %s1606_s23, 1 }
  0x3d   : > { %2045 = sst [smem:[#allocation24_spill]] %s2084_s12  ;;  %p65_p6 = por %p64_p4, %p63_p2 }
  0x3e   : > { %p1674_p10 = por %p2046_p8, %p63_p2  ;;  %s51_s16 = ssub.s32 %s1497_s21, %s2084_s12 }
  0x3f   : > { %p1141_p12 = scmp.lt.s32.totalorder %s1501_s22, 2  ;;  %p54_p0 = scmp.eq.s32.totalorder %s51_s16, 0 }
  0x40   : > { %s2047_s15 = scalar_select %p1674_p10, 1, 0 }
  0x41   : > { %s2016_s28 = sand.u32 1, %s1489_s19   ;;  %s1687_s17 = sshll.u32 %s1497_s21, 6 }
  0x42   : > { %s1684_s29 = sshll.u32 %s2016_s28, 2  ;;  %p1692_p3 = pnand %p1141_p12, %p65_p6 }
  0x43   : > { %s1690_s13 = scalar_select %p54_p0, %s1489_s19, %s56_s14  }
  0x44   : > { %s2049_s24 = scalar_select %p1692_p3, 1, 0 }
  0x45   : > { %2048 = sst [smem:[#allocation25_spill]] %s1690_s13  ;;  %s416_s26 = sand.u32 1, %s1501_s22  }
  0x46   : > { %s2050_s1 = sld [smem:[#allocation26_spill]]  ;;  %s420_s28 = scalar_lea.vmem [#allocation5], %s1684_s29 }
  0x47   : > { %s428_s21 = sshll.u32 %s420_s28, 4  ;;  %s1506_s14 = smov [#allocation10]   ;;  %s1704_s21 = int_to_ptr.vmem [resolvable:$true] %s428_s21 }
  0x48   : > { %s1706_s13 = sshll.u32 %s1506_s14, 4  ;;  %s1708_s11 = scalar_lea.sflag [#allocation6], %s416_s26  ;;  %s381_s13 = int_to_ptr.vmem [resolvable:$true] %s1706_s13 }
  0x49   : > { %p1714_p7 = pneg %p1692_p3 }
  0x4b   : > { %s2051_s3 = scalar_select %p1714_p7, 1, 0 }
  0x4c   : > { %s1701_s16 = scalar_lea.hbm %s2050_s1, %s1687_s17  ;;  %s1238_s22 = scalar_lea.hbm %s2050_s1, 128 }
  0x4d   : > { %s1233_s9 = scalar_lea.hbm %s1701_s16, 64  ;;  %p1239_p2 = scmp.lt.u32.totalorder %s1701_s16, %s2050_s1 }
  0x4e   : > { %p1234_p5 = scmp.ne.s32.totalorder %s1701_s16, %s1233_s9  ;;  %p1240_p4 = scmp.lt.u32.totalorder %s1238_s22, %s1233_s9 }
  0x4f   : > { %p1242_p8 = scmp.lt.u32.totalorder %s1233_s9, %s1701_s16 }
  0x50   : > { %p1236_p9 = pnand %p1714_p7, %p1234_p5  ;;  %p1241_p6 = por %p1240_p4, %p1239_p2 }
  0x52   : > { %p1237_p1 = pneg %p1236_p9  ;;  %p1243_p12 = por %p1242_p8, %p1241_p6 }
  0x54   : > { %p1244_p0 = pnand %p1243_p12, %p1237_p1 }
  0x56   : > { %1247 = shalt.err (!%p1244_p0)
}
  0x57   : > { %s1248_s26 = scalar_lea.vmem %s1704_s21, 64  ;;  %s1507_s12 = smov [#allocation5]  }
  0x58   : > { %p1249_p5 = scmp.ne.s32.totalorder %s1704_s21, %s1248_s26  ;;  %s1253_s28 = sshll.u32 %s1507_s12, 4  ;;  %s1254_s28 = int_to_ptr.vmem [resolvable:$false] %s1253_s28 }
  0x59   : > { %s1255_s8 = scalar_lea.vmem %s1254_s28, 128  ;;  %p1256_p10 = scmp.lt.s32.totalorder %s1704_s21, %s1254_s28 }
  0x5a   : > { %p1251_p9 = pnand %p1249_p5, %p1714_p7  ;;  %p1257_p11 = scmp.lt.s32.totalorder %s1255_s8, %s1248_s26 }
  0x5c   : > { %p1252_p13 = pneg %p1251_p9  ;;  %p1258_p2 = por %p1257_p11, %p1256_p10 }
  0x5e   : > { %p1259_p4 = pnand %p1258_p2, %p1252_p13 }
  0x60   : > { %1262 = shalt.err (!%p1259_p4)
}
  0x61   : > { %1125 = dma.hbm_to_vmem [thread:$0]  (!%p1692_p3), %s1701_s16, 64, %s1704_s21, %s1708_s11  }
  0x62   : > { %s2052_s7 = sld [smem:[#allocation28_spill]]  ;;  %p2053_p11 = scmp.ne.s32.totalorder %s2043_s30, 0 }
  0x64   : > { %p2054_p13 = pneg %p2053_p11 }
  0x68   : > { %s1263_s14 = scalar_lea.hbm %s2052_s7, 256 }
  0x69   : > { %p1264_p1 = scmp.ne.s32.totalorder %s2052_s7, %s1263_s14  ;;  %p1270_p8 = scmp.lt.u32.totalorder %s1263_s14, %s2052_s7 }
  0x6b   : > { %p1266_p10 = pnand %p1264_p1, %p2054_p13 }
  0x6d   : > { %p1267_p6 = pneg %p1266_p10 }
  0x6f   : > { %p1272_p12 = pnand %p1270_p8, %p1267_p6 }
  0x71   : > { %1275 = shalt.err (!%p1272_p12)
}
  0x72   : > { %s1276_s21 = scalar_lea.vmem %s381_s13, 256  ;;  %p2055_p5 = pmov %p2054_p13 }
  0x73   : > { %p1277_p0 = scmp.ne.s32.totalorder %s381_s13, %s1276_s21  ;;  %p1284_p4 = scmp.lt.s32.totalorder %s381_s13, %s381_s13 }
  0x74   : > { %p1285_p3 = scmp.lt.s32.totalorder %s1276_s21, %s1276_s21 }
  0x75   : > { %p1279_p9 = pnand %p1277_p0, %p2055_p5 }
  0x76   : > { %p1286_p7 = por %p1285_p3, %p1284_p4 }
  0x77   : > { %p1280_p2 = pneg %p1279_p9 }
  0x79   : > { %p1287_p1 = pnand %p1286_p7, %p1280_p2 }
  0x7b   : > { %1290 = shalt.err (!%p1287_p1)
}
  0x7c   : > { %s2056_s1 = smov 4   ;;  %s2057_s16 = smov 64  }
  0x7d   : > { %1118 = dma.hbm_to_vmem [thread:$0]  (!%p2053_p11), %s2052_s7, 256, %s381_s13, [#allocation9], %s2057_s16, %s2057_s16, %s2056_s1  }
  0x7e   : > { %s1766_s12 = scalar_lea.hbm %s1995_s0, %s1687_s17  ;;  %s401_s30 = scalar_lea.vmem [#allocation2], %s1684_s29 }
  0x7f   : > { %s409_s26 = sshll.u32 %s401_s30, 4  ;;  %s1775_s8 = scalar_lea.hbm %s1997_s2, %s1687_s17  ;;  %s1769_s26 = int_to_ptr.vmem [resolvable:$true] %s409_s26 }
  0x80   : > { %s2058_s9 = sand.u32 1, %s1489_s19   ;;  %s1291_s1 = scalar_lea.hbm %s1766_s12, 64 }
  0x81   : > { %s398_s13 = scalar_lea.sflag [#allocation3], %s2058_s9  ;;  %p1292_p3 = scmp.ne.s32.totalorder %s1766_s12, %s1291_s1 }
  0x82   : > { %p2059_p7 = scmp.ne.s32.totalorder %s2051_s3, 0  ;;  %s1296_s14 = scalar_lea.hbm %s1995_s0, 128 }
  0x83   : > { %p1297_p10 = scmp.lt.u32.totalorder %s1766_s12, %s1995_s0  ;;  %p1298_p6 = scmp.lt.u32.totalorder %s1296_s14, %s1291_s1 }
  0x84   : > { %p1294_p11 = pnand %p1292_p3, %p2059_p7  ;;  %p1300_p12 = scmp.lt.u32.totalorder %s1291_s1, %s1766_s12 }
  0x85   : > { %p1299_p8 = por %p1298_p6, %p1297_p10 }
  0x86   : > { %p1295_p13 = pneg %p1294_p11 }
  0x87   : > { %p1301_p0 = por %p1300_p12, %p1299_p8 }
  0x89   : > { %p1302_p5 = pnand %p1301_p0, %p1295_p13 }
  0x8b   : > { %1305 = shalt.err (!%p1302_p5)
}
  0x8c   : > { %s1306_s17 = scalar_lea.vmem %s1769_s26, 64  ;;  %s1508_s28 = smov [#allocation2]  }
  0x8d   : > { %p1307_p9 = scmp.ne.s32.totalorder %s1769_s26, %s1306_s17  ;;  %s1311_s21 = sshll.u32 %s1508_s28, 4  ;;  %s1312_s21 = int_to_ptr.vmem [resolvable:$false] %s1311_s21 }
  0x8e   : > { %s1313_s7 = scalar_lea.vmem %s1312_s21, 128  ;;  %p1314_p1 = scmp.lt.s32.totalorder %s1769_s26, %s1312_s21 }
  0x8f   : > { %p1309_p2 = pnand %p1307_p9, %p2059_p7  ;;  %p1315_p3 = scmp.lt.s32.totalorder %s1313_s7, %s1306_s17 }
  0x91   : > { %p1310_p4 = pneg %p1309_p2  ;;  %p1316_p11 = por %p1315_p3, %p1314_p1 }
  0x93   : > { %p1317_p10 = pnand %p1316_p11, %p1310_p4 }
  0x95   : > { %1320 = shalt.err (!%p1317_p10)
}
  0x96   : > { %p2060_p13 = scmp.ne.s32.totalorder %s2049_s24, 0  ;;  %s439_s9 = scalar_lea.vmem [#allocation7], %s1684_s29 }
  0x97   : > { %s447_s1 = sshll.u32 %s439_s9, 4  ;;  %s1321_s16 = scalar_lea.hbm %s1775_s8, 64  ;;  %s448_s1 = int_to_ptr.vmem [resolvable:$true] %s447_s1 }
  0x98   : > { %1122 = dma.hbm_to_vmem [thread:$0]  (!%p2060_p13), %s1766_s12, 64, %s1769_s26, %s398_s13  }
  0x99   : > { %p1322_p6 = scmp.ne.s32.totalorder %s1775_s8, %s1321_s16  ;;  %s1326_s30 = scalar_lea.hbm %s1997_s2, 128 }
  0x9a   : > { %p1327_p0 = scmp.lt.u32.totalorder %s1775_s8, %s1997_s2  ;;  %p1328_p5 = scmp.lt.u32.totalorder %s1326_s30, %s1321_s16 }
  0x9b   : > { %p1324_p8 = pnand %p1322_p6, %p2059_p7  ;;  %p1330_p2 = scmp.lt.u32.totalorder %s1321_s16, %s1775_s8 }
  0x9c   : > { %p1329_p9 = por %p1328_p5, %p1327_p0 }
  0x9d   : > { %p1325_p12 = pneg %p1324_p8 }
  0x9e   : > { %p1331_p4 = por %p1330_p2, %p1329_p9 }
  0xa0   : > { %p1332_p1 = pnand %p1331_p4, %p1325_p12 }
  0xa2   : > { %1335 = shalt.err (!%p1332_p1)
}
  0xa3   : > { %s1336_s29 = scalar_lea.vmem %s448_s1, 64  ;;  %s1509_s12 = smov [#allocation7]  }
  0xa4   : > { %p1337_p3 = scmp.ne.s32.totalorder %s448_s1, %s1336_s29  ;;  %s1341_s26 = sshll.u32 %s1509_s12, 4  ;;  %s1342_s26 = int_to_ptr.vmem [resolvable:$false] %s1341_s26 }
  0xa5   : > { %s1343_s13 = scalar_lea.vmem %s1342_s26, 128  ;;  %p1344_p6 = scmp.lt.s32.totalorder %s448_s1, %s1342_s26 }
  0xa6   : > { %p1339_p11 = pnand %p1337_p3, %p2059_p7  ;;  %p1345_p8 = scmp.lt.s32.totalorder %s1343_s13, %s1336_s29 }
  0xa8   : > { %p1340_p10 = pneg %p1339_p11  ;;  %p1346_p13 = por %p1345_p8, %p1344_p6 }
  0xaa   : > { %p1347_p0 = pnand %p1346_p13, %p1340_p10 }
  0xac   : > { %1350 = shalt.err (!%p1347_p0)
}
  0xad   : > { %p2061_p5 = scmp.ne.s32.totalorder %s2049_s24, 0  ;;  %p2062_p12 = scmp.ne.s32.totalorder %s2042_s27, 0 }
  0xae   : > { %s1822_s3 = sand.u32 (!%p2062_p12), 1, %s1485_s18   ;;  %p2063_p7 = scmp.ne.s32.totalorder (!%p2062_p12), %s2039_s25, 0 }
  0xaf   : > { %1128 = dma.hbm_to_vmem [thread:$0]  (!%p2061_p5), %s1775_s8, 64, %s448_s1, %s1708_s11  }
  0xb0   : > { %456 = sbr.rel (%p2062_p12) target bundleno = 479 (0x1df), region = 56  ;;  %s1825_s21 = sshll.u32 (!%p2062_p12), %s1822_s3, 2 }
  0xb1   : > { %s459_s7 = scalar_lea.sflag (!%p2062_p12), [#allocation3], %s1822_s3  ;;  %s462_s9 = scalar_lea.vmem (!%p2062_p12), [#allocation2], %s1825_s21 }
  0xb7   : > { %1460 = dma.done.wait (%p2063_p7), %s459_s7, 64  }
  0xb8   : > { %1462 = vsyncadd (%p2063_p7), %s459_s7, 4294967232  ;;  %s467_s11 = sand.u32 1, %s1606_s23   ;;  %s471_s24 = scalar_lea.vmem [#allocation5], %s1825_s21 }
  0xb9   : > { %s468_s27 = scalar_lea.sflag [#allocation6], %s467_s11 }
  0xba   : > { %1464 = dma.done.wait (%p2063_p7), %s468_s27, 128  }
  0xbb   : > { %1466 = vsyncadd (%p2063_p7), %s468_s27, 4294967168  ;;  %s480_s8 = scalar_lea.vmem [#allocation7], %s1825_s21  ;;  %p2064_p13 = scmp.eq.s32.totalorder %s1606_s23, 0 }
  0xbd   : > { %1468 = dma.done.wait (%p2064_p13), [#allocation9], 512   ;;  %p2065_p9 = pmov %p2064_p13 }
  0xbe   : > { %v1510_v0 = vmov 0.0   ;;  %vm1511_vm0 = vmmov 0   ;;  %v1199_v1 = vld [vmem:[#allocation8] sm:$0xff]   ;;  %v1200_v2 = vld [vmem:[#allocation8 + $0x8] sm:$0xff]   ;;  %v1201_v3 = vld [vmem:[%s2000_s5] sm:$0xff]   ;;  %vm572_vm1 = vcmask 261120  }
  0xbf   : > { %1470 = vsyncadd (%p2065_p9), [#allocation9], 4294966784  ;;  %1068 = vmatprep.subr.bf16.mxu0 %v1510_v0  ;;  %1076 = vmatprep.subr.bf16.mxu1 %v1510_v0  ;;  %v1203_v4 = vld [vmem:[%s2000_s5 + $0x8] sm:$0xff]   ;;  %v548_v5 = vld [vmem:[%s462_s9] sm:$0xf]  ;;  %s1864_s29 = sshll.u32 %s1493_s20, 6 }
  0xc0   : > { %1072 = vmatprep.mubr.msk.bf16.mxu0 %vm1511_vm0, %v1510_v0  ;;  %1080 = vmatprep.mubr.msk.bf16.mxu1 %vm1511_vm0, %v1510_v0  ;;  %v1202_v6 = vld [vmem:[#allocation10] sm:$0xff]   ;;  %v1204_v8 = vld [vmem:[#allocation10 + $0x8] sm:$0xff]   ;;  %s539_s12 = scalar_lea.vmem [#allocation12], %s1825_s21  ;;  %s532_s13 = scalar_lea.vmem [#allocation11], %s1825_s21  ;;  %vm752_vm2 = vcmask 257024  }
  0xc1   : > { %1069 = vmatpush3.bf16.msra.mxu0 %v1199_v1  ;;  %1077 = vmatpush3.bf16.msra.mxu1 %v1201_v3  ;;  %v617_v7 = vld [vmem:[%s471_s24] sm:$0xf]  ;;  %v684_v9 = vld [vmem:[%s480_s8] sm:$0xf]  ;;  %s797_s26 = sshll.u32 %s539_s12, 4  ;;  %s783_s7 = sshll.u32 %s532_s13, 4  ;;  %s1874_s26 = int_to_ptr.vmem [resolvable:$true] %s797_s26  ;;  %s1885_s7 = int_to_ptr.vmem [resolvable:$true] %s783_s7 }
  0xc2   : > { %1070 = vmatprep.subr.bf16.mxu0 %v1510_v0  ;;  %1078 = vmatprep.subr.bf16.mxu1 %v1510_v0  ;;  %v1039_v10 = vld [vmem:[%s1999_s4] ss:$0 sm:$0xff]  ;;  %s1872_s27 = scalar_lea.hbm %s2005_s10, %s1864_s29  ;;  %s2066_s25 = sld [smem:[#allocation29_spill]] }
  0xc3   : > { %v1043_v12 = vld [vmem:[%s2001_s6] ss:$0 sm:$0xff]  ;;  %s2067_s22 = sld [smem:[#allocation30_spill]]  ;;  %s546_s17 = scalar_lea.vmem [#allocation14], %s1825_s21 }
  0xc4   : > { %s1892_s28 = sshll.u32 %s546_s17, 4  ;;  %s1896_s9 = scalar_lea.sflag [#allocation13], %s467_s11  ;;  %s812_s28 = int_to_ptr.vmem [resolvable:$true] %s1892_s28 }
  0xc5   : > { %1071 = vmatpush3.bf16.msra.mxu0 %v1200_v2  ;;  %1079 = vmatpush3.bf16.msra.mxu1 %v1203_v4  ;;  %s1351_s20 = scalar_lea.vmem %s1874_s26, 64  ;;  %p2069_p4 = scmp.ne.s32.totalorder %s2047_s15, 0 }
  0xc6   : > { %1084 = vmatprep.subr.bf16.mxu0 %v1510_v0  ;;  %p1352_p2 = scmp.ne.s32.totalorder %s1874_s26, %s1351_s20  ;;  %s1512_s24 = smov [#allocation12]  }
  0xc7   : > { %s1355_s8 = sshll.u32 %s1512_s24, 4  ;;  %s1356_s8 = int_to_ptr.vmem [resolvable:$false] %s1355_s8 }
  0xc8   : > { %1073 = vmatmul.mubr.msk.bf16.vlgmr.msra.gmra.mrb[0].mxu0 %vm572_vm1, %v548_v5  ;;  %1081 = vmatmul.mubr.msk.bf16.vlgmr.msra.gmra.mrb[0].mxu1 %vm572_vm1, %v617_v7  ;;  %v1047_v25 = vld [vmem:[%s2066_s25] ss:$0 sm:$0xff]  ;;  %p1353_p1 = pnand %p1352_p2, %p2069_p4  ;;  %s1357_s25 = scalar_lea.vmem %s1356_s8, 128 }
  0xc9   : > { %1085 = vmatpush3.bf16.msra.mxu0 %v1202_v6  ;;  %1088 = vmatprep.mubr.msk.bf16.mxu0 %vm1511_vm0, %v1510_v0  ;;  %s2068_s14 = smov %s2067_s22  ;;  %s1883_s30 = scalar_lea.hbm %s2067_s22, %s1864_s29 }
  0xca   : > { %1086 = vmatprep.subr.bf16.mxu0 %v1510_v0  ;;  %p1354_p3 = pneg %p1353_p1  ;;  %p1358_p11 = scmp.lt.s32.totalorder %s1874_s26, %s1356_s8 }
  0xcb   : > { %p1359_p10 = scmp.lt.s32.totalorder %s1357_s25, %s1351_s20 }
  0xcd   : > { %1087 = vmatpush3.bf16.msra.mxu0 %v1204_v8  ;;  %p1360_p6 = por %p1359_p10, %p1358_p11 }
  0xcf   : > { %p1361_p8 = pnand %p1360_p6, %p1354_p3 }
  0xd0   : > { %1089 = vmatmul.mubr.msk.bf16.vlgmr.msra.gmra.mrb[4].mxu0 %vm572_vm1, %v684_v9 }
 0x19b   : > { %v610_v11 = vpop.f32.mrb[0].mxu0  ;;  %v678_v16 = vpop.f32.mrb[0].mxu1 }
 0x19c   : > { %v611_v13 = vadd.f32 %v1039_v10, %v610_v11  ;;  %v1074_v14 = vpop.f32.mrb[1].mxu0  ;;  %v679_v19 = vadd.f32 %v1043_v12, %v678_v16  ;;  %v1082_v20 = vpop.f32.mrb[1].mxu1 }
 0x19d   : > { %v613_v15 = vpop.f32.mrb[2].mxu0  ;;  %v681_v21 = vpop.f32.mrb[2].mxu1 }
 0x19e   : > { %v616_v17 = vmul.f32 0.35355338, %v611_v13  ;;  %v1075_v18 = vpop.f32.mrb[3].mxu0  ;;  %v754_v23 = vpack.c.bf16 %v679_v19, %v679_v19  ;;  %v1083_v24 = vpop.f32.mrb[3].mxu1 }
 0x1a0   : > { %v751_v22 = vpack.c.bf16 %v616_v17, %v616_v17  ;;  %755 = vst.msk [vmem:[%s539_s12] sm:$0xf] %vm752_vm2, %v754_v23 }
 0x1a2   : > { %753 = vst.msk [vmem:[%s532_s13] sm:$0xf] %vm752_vm2, %v751_v22 }
 0x1a3   : > { %v745_v26 = vpop.f32.mrb[4].mxu0 }
 0x1a4   : > { %1364 = shalt.err (!%p1361_p8)
}
 0x1a5   : > { %s1365_s23 = scalar_lea.hbm %s1872_s27, 64  ;;  %s1369_s13 = scalar_lea.hbm %s2005_s10, 128 }
 0x1a6   : > { %p1366_p0 = scmp.ne.s32.totalorder %s1872_s27, %s1365_s23  ;;  %p1370_p7 = scmp.lt.u32.totalorder %s1872_s27, %s2005_s10 }
 0x1a7   : > { %p1371_p13 = scmp.lt.u32.totalorder %s1369_s13, %s1365_s23  ;;  %p1373_p2 = scmp.lt.u32.totalorder %s1365_s23, %s1872_s27 }
 0x1a8   : > { %p1367_p5 = pnand %p1366_p0, %p2069_p4 }
 0x1a9   : > { %p1372_p9 = por %p1371_p13, %p1370_p7 }
 0x1aa   : > { %p1368_p12 = pneg %p1367_p5 }
 0x1ab   : > { %p1374_p1 = por %p1373_p2, %p1372_p9 }
 0x1ad   : > { %p1375_p3 = pnand %p1374_p1, %p1368_p12 }
 0x1af   : > { %1378 = shalt.err (!%p1375_p3)
}
 0x1b0   : > { %1107 = dma.vmem_to_hbm [thread:$0]  (%p2069_p4), %s1874_s26, 64, %s1872_s27, %s1896_s9   ;;  %v746_v27 = vadd.f32 %v1047_v25, %v745_v26  ;;  %v1090_v28 = vpop.f32.mrb[5].mxu0 }
 0x1b1   : > { %s759_s22 = scalar_lea.sflag [#allocation4], %s1822_s3  ;;  %s1379_s20 = scalar_lea.vmem %s1885_s7, 64 }
 0x1b2   : > { %p1380_p11 = scmp.ne.s32.totalorder %s1885_s7, %s1379_s20  ;;  %s1513_s24 = smov [#allocation11]  }
 0x1b3   : > { %s1383_s8 = sshll.u32 %s1513_s24, 4  ;;  %s1384_s8 = int_to_ptr.vmem [resolvable:$false] %s1383_s8 }
 0x1b4   : > { %p1381_p10 = pnand %p1380_p11, %p2069_p4  ;;  %s1385_s25 = scalar_lea.vmem %s1384_s8, 128 }
 0x1b5   : > { %p1386_p8 = scmp.lt.s32.totalorder %s1885_s7, %s1384_s8  ;;  %p1387_p0 = scmp.lt.s32.totalorder %s1385_s25, %s1379_s20 }
 0x1b6   : > { %p1382_p6 = pneg %p1381_p10 }
 0x1b7   : > { %p1388_p5 = por %p1387_p0, %p1386_p8 }
 0x1b9   : > { %p1389_p12 = pnand %p1388_p5, %p1382_p6 }
 0x1bb   : > { %1392 = shalt.err (!%p1389_p12)
}
 0x1bc   : > { %s1393_s3 = scalar_lea.hbm %s1883_s30, 64  ;;  %s1397_s23 = scalar_lea.hbm %s2068_s14, 128 }
 0x1bd   : > { %p1394_p7 = scmp.ne.s32.totalorder %s1883_s30, %s1393_s3  ;;  %p1398_p2 = scmp.lt.u32.totalorder %s1883_s30, %s2068_s14 }
 0x1be   : > { %p1399_p1 = scmp.lt.u32.totalorder %s1397_s23, %s1393_s3  ;;  %p1401_p11 = scmp.lt.u32.totalorder %s1393_s3, %s1883_s30 }
 0x1bf   : > { %p1395_p13 = pnand %p1394_p7, %p2069_p4 }
 0x1c0   : > { %p1400_p3 = por %p1399_p1, %p1398_p2 }
 0x1c1   : > { %p1396_p9 = pneg %p1395_p13 }
 0x1c2   : > { %p1402_p10 = por %p1401_p11, %p1400_p3 }
 0x1c4   : > { %p1403_p6 = pnand %p1402_p10, %p1396_p9 }
 0x1c6   : > { %1406 = shalt.err (!%p1403_p6)
}
 0x1c7   : > { %1106 = dma.vmem_to_hbm [thread:$0]  (%p2069_p4), %s1885_s7, 64, %s1883_s30, %s759_s22   ;;  %v748_v29 = vpop.f32.mrb[6].mxu0  ;;  %v756_v30 = vpack.c.bf16 %v746_v27, %v746_v27 }
 0x1c8   : > { %v1091_v31 = vpop.f32.mrb[7].mxu0  ;;  %s2070_s16 = sld [smem:[#allocation31_spill]]  ;;  %s1407_s24 = scalar_lea.vmem %s812_s28, 64 }
 0x1c9   : > { %757 = vst.msk [vmem:[%s546_s17] sm:$0xf] %vm752_vm2, %v756_v30  ;;  %p1408_p8 = scmp.ne.s32.totalorder %s812_s28, %s1407_s24  ;;  %s1514_s8 = smov [#allocation14]  }
 0x1ca   : > { %s1411_s25 = sshll.u32 %s1514_s8, 4  ;;  %s1412_s25 = int_to_ptr.vmem [resolvable:$false] %s1411_s25 }
 0x1cb   : > { %p1409_p0 = pnand %p1408_p8, %p2069_p4  ;;  %s1413_s7 = scalar_lea.vmem %s1412_s25, 128 }
 0x1cc   : > { %p1414_p12 = scmp.lt.s32.totalorder %s812_s28, %s1412_s25  ;;  %p1415_p7 = scmp.lt.s32.totalorder %s1413_s7, %s1407_s24 }
 0x1cd   : > { %p1410_p5 = pneg %p1409_p0 }
 0x1ce   : > { %s1946_s20 = scalar_lea.hbm %s2070_s16, %s1864_s29  ;;  %p1416_p13 = por %p1415_p7, %p1414_p12 }
 0x1d0   : > { %p1417_p9 = pnand %p1416_p13, %p1410_p5 }
 0x1d2   : > { %1420 = shalt.err (!%p1417_p9)
}
 0x1d3   : > { %s1421_s21 = scalar_lea.hbm %s1946_s20, 64  ;;  %s1425_s17 = scalar_lea.hbm %s2070_s16, 128 }
 0x1d4   : > { %p1422_p2 = scmp.ne.s32.totalorder %s1946_s20, %s1421_s21  ;;  %p1426_p11 = scmp.lt.u32.totalorder %s1946_s20, %s2070_s16 }
 0x1d5   : > { %p1427_p10 = scmp.lt.u32.totalorder %s1425_s17, %s1421_s21  ;;  %p1429_p8 = scmp.lt.u32.totalorder %s1421_s21, %s1946_s20 }
 0x1d6   : > { %p1423_p1 = pnand %p1422_p2, %p2069_p4 }
 0x1d7   : > { %p1428_p6 = por %p1427_p10, %p1426_p11 }
 0x1d8   : > { %p1424_p3 = pneg %p1423_p1 }
 0x1d9   : > { %p1430_p0 = por %p1429_p8, %p1428_p6 }
 0x1db   : > { %p1431_p5 = pnand %p1430_p0, %p1424_p3 }
 0x1dd   : > { %1434 = shalt.err (!%p1431_p5)
}
 0x1de   : > { %1108 = dma.vmem_to_hbm [thread:$0]  (%p2069_p4), %s812_s28, 64, %s1946_s20, %s1896_s9  }
 0x1df PF: > { %s2071_s26 = sld [smem:[#allocation20_spill]]  ;;  %s2072_s27 = sld [smem:[#allocation23_spill]] }
 0x1e0   : > { %s2073_s23 = sld [smem:[#allocation22_spill]] }
 0x1e5   : > { %s823_s11 = sand.u32 1, %s2071_s26   ;;  %p2074_p12 = scmp.ne.s32.totalorder %s2072_s27, 0 }
 0x1e6   : > { %p2075_p7 = scmp.ge.s32.totalorder %s2073_s23, 2  ;;  %s824_s12 = scalar_lea.sflag [#allocation4], %s823_s11 }
 0x1e8   : > { %p1130_p13 = pnand %p2075_p7, %p2074_p12 }
 0x1ea   : > { %1472 = dma.done.wait (!%p1130_p13), %s824_s12, 64  }
 0x1eb   : > { %1474 = vsyncadd (!%p1130_p13), %s824_s12, 4294967232  ;;  %s2076_s13 = sadd.s32 4294967294, %s2073_s23  }
 0x1ec   : > { %s832_s1 = sand.u32 1, %s2076_s13  }
 0x1ed   : > { %s833_s24 = scalar_lea.sflag [#allocation13], %s832_s1 }
 0x1ee   : > { %1476 = dma.done.wait (!%p1130_p13), %s833_s24, 128  }
 0x1ef   : > { %1478 = vsyncadd (!%p1130_p13), %s833_s24, 4294967168  ;;  %s35_s22 = sadd.s32 1, %s2073_s23   ;;  %s2077_s15 = sld [smem:[#allocation25_spill]] }
 0x1f0   : > { %p32_p4 = scmp.ge.s32.totalorder %s35_s22, 4   ;;  %s2078_s20 = sld [smem:[#allocation21_spill]] }
 0x1f1   : > { %s2079_s21 = sld [smem:[#allocation24_spill]]  ;;  %s2080_s17 = smov %s1485_s18 }
 0x1f2   : > { %s2081_s18 = smov %s1489_s19  ;;  %34 = sbr.rel (!%p32_p4) target bundleno = 18 (0x12), region = 165 }
 0x1f5   : > { %s2082_s19 = smov %s2077_s15 }
 0x1f9   :  { %847 = vsyncpa [#allocation3], 1 }
 0x1fa   :  { %849 = vsyncpa [#allocation3 + $0x1], 1 }
 0x1fb   :  { %850 = vsyncpa [#allocation6], 1 }
 0x1fc   :  { %852 = vsyncpa [#allocation6 + $0x1], 1 }
 0x1fd   :  { %853 = vsyncpa [#allocation9], 1 }
 0x1fe   :  { %854 = vsyncpa [#allocation4], 1 }
 0x1ff   :  { %856 = vsyncpa [#allocation4 + $0x1], 1 }
 0x200   :  { %857 = vsyncpa [#allocation13], 1 }
 0x201   :  { %859 = vsyncpa [#allocation13 + $0x1], 1 }

</bundles_post_ra>
